<compile_context>
chip_gen: v7x
topology: tpu7x:2x2x1
jax: 0.10.0
libtpu: 0.0.40
codegen_flags: <defaults>
</compile_context>

<pallas_src>
import functools
import math

import jax
import jax.numpy as jnp
from jax import lax
from jax.experimental import pallas as pl
from jax.experimental.pallas import tpu as pltpu


# splitmix32-style mixer constants, expressed as int32 bit patterns.
_GOLD = 0x9E3779B9 - (1 << 32)
_M1 = 0x7FEB352D
_M2 = 0x846CA68B - (1 << 32)


def _splitmix32(h):
    """xor-shift / wraparound-multiply mixer on int32 (scalar or array).

    jnp's >> on int32 is an arithmetic shift; the map stays bijective and
    mixes plenty well for dropout masks while using only ops with solid
    Mosaic *and* interpret-mode lowering (xor, shift, int32 mul, compare).
    """
    h = h ^ (h >> 16)
    h = h * jnp.int32(_M1)
    h = h ^ (h >> 15)
    h = h * jnp.int32(_M2)
    h = h ^ (h >> 16)
    return h


def _pe_add_kernel(x_ref, pe_ref, o_ref):
    # x_ref / pe_ref / o_ref: (tile_s, B*D) contiguous, lane-dense slabs.
    o_ref[...] = (x_ref[...] + pe_ref[...]).astype(o_ref.dtype)


def _pe_add_dropout_kernel(seed_ref, x_ref, pe_ref, o_ref, *, keep_threshold, scale):
    tile_s, n_cols = x_ref.shape
    i = pl.program_id(0)

    # Global element index -> mask is independent of the chosen tiling.
    row = lax.broadcasted_iota(jnp.int32, (tile_s, n_cols), 0) + i * tile_s
    col = lax.broadcasted_iota(jnp.int32, (tile_s, n_cols), 1)
    idx = row * jnp.int32(n_cols) + col

    # Pre-mix the seed (scalar work) so adjacent integer seeds give
    # decorrelated masks across training steps, then hash per element.
    k = _splitmix32(seed_ref[0] ^ jnp.int32(_GOLD))
    bits = _splitmix32(idx ^ k)
    keep = bits >= jnp.int32(keep_threshold)      # P(keep) = 1 - p (to 2^-32)

    y = x_ref[...].astype(jnp.float32) + pe_ref[...].astype(jnp.float32)
    # Single select + multiply; scale applied in f32 to avoid bf16 bias,
    # downcast once at the store.
    y = y * jnp.where(keep, jnp.float32(scale), jnp.float32(0.0))
    o_ref[...] = y.astype(o_ref.dtype)


def make_pe(d_model, max_len=500, dtype=jnp.float32):
    """Builds the (max_len, 1, d_model) sinusoidal buffer, same as __init__."""
    position = jnp.arange(max_len, dtype=jnp.float32)[:, None]
    div_term = jnp.exp(
        jnp.arange(0, d_model, 2, dtype=jnp.float32) * -(math.log(10000.0) / d_model)
    )
    pe = jnp.zeros((max_len, 1, d_model), dtype=jnp.float32)
    pe = pe.at[:, 0, 0::2].set(jnp.sin(position * div_term))
    pe = pe.at[:, 0, 1::2].set(jnp.cos(position * div_term))
    return pe.astype(dtype)


def prepare_pe(pe, batch, dtype):
    """One-time init: (max_len, 1, D) buffer -> (max_len, batch*D) table.

    Do this once (like register_buffer), not per forward call: it bakes in the
    dtype cast and the batch tiling so the kernel only streams it.
    """
    max_len, d_model = pe.shape[0], pe.shape[-1]
    pe2d = pe.reshape(max_len, d_model).astype(dtype)
    return jnp.broadcast_to(
        pe2d[:, None, :], (max_len, batch, d_model)
    ).reshape(max_len, batch * d_model)


def positional_encoding(x, pe_table, *, p=0.1, training=False, seed=0,
                        tile_s=None, vmem_budget_bytes=24 * 1024 * 1024):
    """Forward pass: (x + pe[:S]) followed by dropout (identity in eval).

    x:        (S, B, D)
    pe_table: (max_len, B*D) from prepare_pe (or any dtype-matching table).
    """
    S, B, D = x.shape
    bd = B * D
    assert pe_table.shape[0] >= S and pe_table.shape[-1] == bd, \
        "pe_table must be prepare_pe(pe, batch=B, ...) with max_len >= seq_len"
    if pe_table.dtype != x.dtype:
        # Fallback only; prefer prepare_pe(..., dtype=x.dtype) at init.
        pe_table = pe_table.astype(x.dtype)

    # Fold batch into the lane dim: contiguous (free) reshape, full-bandwidth
    # DMAs, lane-dense stores for realistic d_model sizes.
    x2d = x.reshape(S, bd)

    itemsize = jnp.dtype(x.dtype).itemsize
    if tile_s is None:
        # Working set per step: (x + pe + out) tiles, double-buffered.
        rows = vmem_budget_bytes // (2 * 3 * bd * itemsize)
        tile_s = int(min(max(rows, 8), S))

    if S >= 8:
        tile_s = max(8, (min(tile_s, S) // 8) * 8)
        # v7x has two TensorCores: keep >= 2 grid steps when the sequence
        # allows so the "parallel" axis can be split across cores.
        if tile_s >= S and S >= 16:
            tile_s = max(8, (((S + 1) // 2 + 7) // 8) * 8)
        pe_in = pe_table                     # block rows are a multiple of 8
    else:
        tile_s = S
        pe_in = pe_table[:S]                 # tiny slice so block == full dim

    grid = (pl.cdiv(S, tile_s),)
    working = 2 * 3 * tile_s * bd * itemsize
    vmem_limit = int(max(16 * 1024 * 1024, working + (2 << 20)))
    cp = pltpu.CompilerParams(
        dimension_semantics=("parallel",),   # independent sequence tiles
        vmem_limit_bytes=vmem_limit,
    )
    out_shape = jax.ShapeDtypeStruct((S, bd), x.dtype)

    if not training or p <= 0.0:
        out2d = pl.pallas_call(
            _pe_add_kernel,
            out_shape=out_shape,
            grid=grid,
            in_specs=[pl.BlockSpec((tile_s, bd), lambda i: (i, 0)),
                      pl.BlockSpec((tile_s, bd), lambda i: (i, 0))],
            out_specs=pl.BlockSpec((tile_s, bd), lambda i: (i, 0)),
            compiler_params=cp,
        )(x2d, pe_in)
        return out2d.reshape(S, B, D)

    if p >= 1.0:
        # Degenerate dropout(p=1): everything is dropped.
        return jnp.zeros_like(x)

    # keep iff hash >= t with signed threshold t = p*2^32 - 2^31, so that
    # P(keep) = 1 - p up to 2^-32 quantisation.
    t = int(round(p * 4294967296.0)) - 2147483648
    t = max(-2147483648, min(2147483647, t))
    scale = 1.0 / (1.0 - p)
    kernel = functools.partial(_pe_add_dropout_kernel, keep_threshold=t, scale=scale)
    # Callers should advance `seed` every training step; any distinct integer
    # gives a decorrelated mask thanks to the in-kernel seed mixing.
    seed_arr = jnp.asarray([seed], dtype=jnp.int32)

    out2d = pl.pallas_call(
        kernel,
        out_shape=out_shape,
        grid_spec=pltpu.PrefetchScalarGridSpec(
            num_scalar_prefetch=1,
            grid=grid,
            in_specs=[pl.BlockSpec((tile_s, bd), lambda i, seed_ref: (i, 0)),
                      pl.BlockSpec((tile_s, bd), lambda i, seed_ref: (i, 0))],
            out_specs=pl.BlockSpec((tile_s, bd), lambda i, seed_ref: (i, 0)),
        ),
        compiler_params=cp,
    )(seed_arr, x2d, pe_in)
    return out2d.reshape(S, B, D)


if __name__ == "__main__":
    # Small shapes consistent with the module: seq=8, batch=2, d_model=32.
    S, B, D = 8, 2, 32
    max_len = 500
    dropout_p = 0.1

    key = jax.random.PRNGKey(0)
    x = jax.random.normal(key, (S, B, D), dtype=jnp.float32)
    pe = make_pe(D, max_len=max_len, dtype=jnp.float32)        # module buffer
    pe_table = prepare_pe(pe, batch=B, dtype=x.dtype)          # one-time init

    ref = x + pe[:S]                                           # pure-JAX reference

    # Eval-mode forward (dropout is identity), matching module.eval().
    out = jax.block_until_ready(
        positional_encoding(x, pe_table, p=dropout_p, training=False))
    assert out.shape == (S, B, D) and out.dtype == x.dtype
    assert jnp.allclose(out, ref, atol=1e-6, rtol=1e-6)

    # Training-mode forward: every surviving element must equal (x+pe)/(1-p).
    out_tr = jax.block_until_ready(
        positional_encoding(x, pe_table, p=dropout_p, training=True, seed=123))
    scale = 1.0 / (1.0 - dropout_p)
    kept_ok = jnp.where(out_tr != 0.0, jnp.abs(out_tr - ref * scale) < 1e-4, True)
    assert out_tr.shape == (S, B, D) and bool(jnp.all(kept_ok))

    print("KERNEL_OK")
</pallas_src>

<mosaic_0001>
module attributes {stable_mosaic.version = 11 : i64} {
  func.func @_pe_add_kernel(%arg0: i32, %arg1: memref<8x64xf32, #tpu.memory_space<vmem>>, %arg2: memref<8x64xf32, #tpu.memory_space<vmem>>, %arg3: memref<8x64xf32, #tpu.memory_space<vmem>>) attributes {dimension_semantics = [#tpu.dimension_semantics<parallel>], iteration_bounds = array<i64: 1>, scalar_prefetch = 0 : i64, scratch_operands = 0 : i64, tpu.core_type = #tpu.core_type<tc>, window_params = [{transform_indices = @transform_0, window_bounds = array<i64: 8, 64>}, {transform_indices = @transform_1, window_bounds = array<i64: 8, 64>}, {transform_indices = @transform_2, window_bounds = array<i64: 8, 64>}]} {
    %c0 = arith.constant 0 : index
    %c0_0 = arith.constant 0 : index
    %0 = vector.load %arg1[%c0, %c0_0] : memref<8x64xf32, #tpu.memory_space<vmem>>, vector<8x64xf32>
    %c0_1 = arith.constant 0 : index
    %c0_2 = arith.constant 0 : index
    %1 = vector.load %arg2[%c0_1, %c0_2] : memref<8x64xf32, #tpu.memory_space<vmem>>, vector<8x64xf32>
    %2 = arith.addf %0, %1 : vector<8x64xf32>
    %c0_3 = arith.constant 0 : index
    %c0_4 = arith.constant 0 : index
    %3 = vector.load %arg3[%c0_3, %c0_4] : memref<8x64xf32, #tpu.memory_space<vmem>>, vector<8x64xf32>
    tpu.vector_store %arg3[%c0_3, %c0_4], %2 {strides = array<i32>} : memref<8x64xf32, #tpu.memory_space<vmem>>, vector<8x64xf32>,
    return
  }
  func.func @transform_0(%arg0: i32) -> (i32, i32) {
    %c0_i32 = arith.constant 0 : i32
    %c0_i32_0 = arith.constant 0 : i32
    return %arg0, %c0_i32 : i32, i32
  }
  func.func @transform_1(%arg0: i32) -> (i32, i32) {
    %c0_i32 = arith.constant 0 : i32
    %c0_i32_0 = arith.constant 0 : i32
    return %arg0, %c0_i32 : i32, i32
  }
  func.func @transform_2(%arg0: i32) -> (i32, i32) {
    %c0_i32 = arith.constant 0 : i32
    %c0_i32_0 = arith.constant 0 : i32
    return %arg0, %c0_i32 : i32, i32
  }
}

</mosaic_0001>

<bundles_post_ra>
// kernel: tpu_custom_call.1
= control target key start
LH: loop header
LB: loop body
LE: loop exit
PB: predicated region body
PF: predicated region fallthrough
CT: control target
= control target key end

     0   :  { %vm15_vm0 = vcmask 523264   ;;  %s90_s0 = inlined_call_operand.vmem [shape: f32[8,64], index: 0, kind: input, shape index: {}]   ;;  %s91_s1 = inlined_call_operand.vmem [shape: f32[500,64], index: 1, kind: input, shape index: {}]   ;;  %s92_s2 = inlined_call_operand.hbm [shape: f32[8,64], index: 2, kind: output, shape index: {}]  }
   0x1   :  { %v12_v0 = vld [vmem:[%s90_s0] sm:$0xff] }
   0x2   :  { %v13_v1 = vld [vmem:[%s91_s1] sm:$0xff] }
   0x3   :  { %7 = vsyncpa [#allocation3], 0  ;;  %v14_v2 = vadd.f32 %v13_v1, %v12_v0  ;;  %s56_s13 = smov [#allocation2]  }
   0x4   :  { %s23_s14 = sshll.u32 %s56_s13, 4  ;;  %s24_s14 = int_to_ptr.vmem [resolvable:$true] %s23_s14 }
   0x5   :  { %16 = vst.msk [vmem:[#allocation2] sm:$0xff] %vm15_vm0, %v14_v2  ;;  %s32_s15 = scalar_lea.vmem %s24_s14, 128  ;;  %p37_p1 = scmp.lt.s32.totalorder %s24_s14, %s24_s14 }
   0x6   :  { %p33_p0 = scmp.ne.s32.totalorder %s24_s14, %s32_s15  ;;  %p38_p2 = scmp.lt.s32.totalorder %s32_s15, %s32_s15 }
   0x8   :  { %p39_p3 = por %p38_p2, %p37_p1 }
   0xa   :  { %p40_p4 = pnand %p39_p3, %p33_p0 }
   0xc   :  { %43 = shalt.err (!%p40_p4)
}
   0xd   :  { %s44_s17 = scalar_lea.hbm %s92_s2, 128 }
   0xe   :  { %p45_p5 = scmp.ne.s32.totalorder %s92_s2, %s44_s17  ;;  %p48_p6 = scmp.lt.u32.totalorder %s44_s17, %s92_s2 }
  0x10   :  { %p50_p7 = pnand %p48_p6, %p45_p5 }
  0x12   :  { %53 = shalt.err (!%p50_p7)
}
  0x13   :  { %26 = dma.vmem_to_hbm [thread:$0]  %s24_s14, 128, %s92_s2, [#allocation3]  }
  0x14   :  { %54 = dma.done.wait [#allocation3], 128  }
  0x15   :  { %55 = vsyncadd [#allocation3], 4294967168 }
  0x16   :  { %30 = vsyncpa [#allocation3], 1 }

</bundles_post_ra>
